<compile_context>
chip_gen: v5e
topology: v5e:2x2
jax: 0.10.0
libtpu: 0.0.40
codegen_flags: <defaults>
</compile_context>

<pallas_src>
import functools

import jax
import jax.numpy as jnp
from jax.experimental import pallas as pl
from jax.experimental.pallas import tpu as pltpu


LANES = 128                        # last dim maps to the 128-lane axis
SUBLANE_PACK = 16                  # sublane multiple valid for f32 (8) and bf16 (16)
TARGET_BLOCK_BYTES = 4 << 20       # ~4 MiB per input block, dtype-independent
VMEM_LIMIT_BYTES = 48 << 20        # > v5e's 16 MiB default, < v7x's 64 MiB physical
MIN_SPLIT_ROWS = 2 * SUBLANE_PACK  # don't force a 2-step grid below this


def _round_up(x, m):
    return -(-x // m) * m


def _haarpsi_score_kernel(c_ref, x_ref, y_ref, o_ref, *, approx_recip):
    """Elementwise HaarPSI similarity on one (block_rows, 128) tile.

    c_ref: SMEM (1,) float32 scalar parameter
    x_ref, y_ref, o_ref: VMEM tiles in the caller's dtype (f32 compute inside)
    """
    c = c_ref[0]
    c2 = c * c
    x = x_ref[...].astype(jnp.float32)
    y = y_ref[...].astype(jnp.float32)
    num = 2.0 * x * y + c2
    den = x * x + y * y + c2
    if approx_recip:
        # 16-bit outputs: EUP reciprocal error is below output rounding error
        # and keeps the VALU slot free (kernel stays HBM-bound at bf16 on v7x).
        out = num * pl.reciprocal(den, approx=True)
    else:
        out = num / den
    o_ref[...] = out.astype(o_ref.dtype)


def haarpsi_score(x, y, c):
    """Compute (2xy + c^2) / (x^2 + y^2 + c^2) elementwise via Pallas.

    x, y: arrays of identical shape (NCHW or anything else — elementwise).
    c: scalar (python float or shape-(1,) array), the (learnable) parameter.
    """
    assert x.shape == y.shape, "x and y must have the same shape"
    orig_shape = x.shape
    out_dtype = x.dtype
    itemsize = x.dtype.itemsize
    n = int(x.size)

    xf = x.reshape(-1)
    yf = y.reshape(-1)

    # Rare ragged-tail path only: pad to a multiple of 128 lanes with ones
    # (keeps the denominator finite).  Common NCHW shapes with n % 128 == 0
    # take the copy-free path.
    n_pad = (-n) % LANES
    if n_pad:
        ones = jnp.ones((n_pad,), out_dtype)
        xf = jnp.concatenate([xf, ones])
        yf = jnp.concatenate([yf, ones])

    rows = xf.shape[0] // LANES
    x2d = xf.reshape(rows, LANES)
    y2d = yf.reshape(rows, LANES)

    # Byte-based block sizing: same ~4 MiB block for every dtype.
    max_block_rows = max(
        SUBLANE_PACK,
        (TARGET_BLOCK_BYTES // (LANES * itemsize)) // SUBLANE_PACK * SUBLANE_PACK,
    )

    # Roughly-equal steps, rounded to an even count so both v7x TensorCores
    # are busy; near-free on single-TC chips (one extra ~0.35us step).
    num_steps = -(-rows // max_block_rows)
    if num_steps % 2 == 1 and rows >= MIN_SPLIT_ROWS:
        num_steps += 1
    block_rows = _round_up(-(-rows // num_steps), SUBLANE_PACK)
    if block_rows >= rows:
        # Full-extent block: legal for any row count (no sublane-multiple
        # requirement), and avoids an oversized block past the array extent.
        block_rows = rows
    grid = (-(-rows // block_rows),)

    c_arr = jnp.asarray(c, dtype=jnp.float32).reshape(1)
    approx_recip = itemsize <= 2  # bf16 / f16 outputs

    kernel = functools.partial(_haarpsi_score_kernel, approx_recip=approx_recip)

    n_total = rows * LANES
    cost = pl.CostEstimate(
        flops=9 * n_total,
        transcendentals=n_total if approx_recip else 0,
        bytes_accessed=3 * n_total * itemsize,
    )

    out2d = pl.pallas_call(
        kernel,
        out_shape=jax.ShapeDtypeStruct((rows, LANES), out_dtype),
        grid_spec=pltpu.PrefetchScalarGridSpec(
            num_scalar_prefetch=0,
            grid=grid,
            in_specs=[
                # c lives in SMEM for the whole call (no per-step pipelining).
                pl.BlockSpec(memory_space=pltpu.MemorySpace.SMEM),
                pl.BlockSpec((block_rows, LANES), lambda i: (i, 0)),
                pl.BlockSpec((block_rows, LANES), lambda i: (i, 0)),
            ],
            out_specs=pl.BlockSpec((block_rows, LANES), lambda i: (i, 0)),
        ),
        compiler_params=pltpu.CompilerParams(
            dimension_semantics=("parallel",),
            vmem_limit_bytes=VMEM_LIMIT_BYTES,
        ),
        cost_estimate=cost,
    )(c_arr, x2d, y2d)

    out_flat = out2d.reshape(-1)
    if n_pad:
        out_flat = out_flat[:n]
    return out_flat.reshape(orig_shape)


def haarpsi_score_ref(x, y, c):
    c = jnp.asarray(c, jnp.float32).reshape(())
    xf = x.astype(jnp.float32)
    yf = y.astype(jnp.float32)
    return ((2.0 * xf * yf + c**2) / (xf**2 + yf**2 + c**2)).astype(x.dtype)


if __name__ == "__main__":
    key = jax.random.PRNGKey(0)
    kx, ky = jax.random.split(key)

    # Module __init__: learnable c, shape (1,), deterministic init.
    init_c = 2.0
    c_param = jnp.array([init_c], dtype=jnp.float32)

    # 1) NCHW f32, copy-free fast path (2*4*16*16 = 2048 = 16*128), single block.
    B, C, H, W = 2, 4, 16, 16
    x = jax.random.normal(kx, (B, C, H, W), dtype=jnp.float32)
    y = jax.random.normal(ky, (B, C, H, W), dtype=jnp.float32)
    out = jax.block_until_ready(haarpsi_score(x, y, c_param))
    ref = haarpsi_score_ref(x, y, c_param)
    assert out.shape == (B, C, H, W)
    assert out.dtype == x.dtype
    assert jnp.allclose(out, ref, atol=1e-5, rtol=1e-5), (
        float(jnp.max(jnp.abs(out - ref)))
    )

    # 2) Docstring example (ragged lane tail): c=2, x=[0,1,2], y=0 -> [1, 0.8, 0.5]
    xd = jnp.array([0.0, 1.0, 2.0], dtype=jnp.float32)
    yd = jnp.zeros((3,), dtype=jnp.float32)
    outd = jax.block_until_ready(haarpsi_score(xd, yd, 2.0))
    assert jnp.allclose(outd, jnp.array([1.0, 0.8, 0.5]), atol=1e-6)

    # 3) Original-dtype bf16 streaming: f32 compute + EUP reciprocal in-kernel.
    xb = x.astype(jnp.bfloat16)
    yb = y.astype(jnp.bfloat16)
    outb = jax.block_until_ready(haarpsi_score(xb, yb, c_param))
    refb = haarpsi_score_ref(xb, yb, c_param)
    assert outb.dtype == jnp.bfloat16
    assert jnp.allclose(
        outb.astype(jnp.float32), refb.astype(jnp.float32), atol=2e-2, rtol=2e-2
    )

    # 4) Reviewer concern: n % 128 == 0 but rows % 16 != 0 -> full-extent block.
    x3 = jax.random.normal(kx, (3, 128), dtype=jnp.float32)
    y3 = jax.random.normal(ky, (3, 128), dtype=jnp.float32)
    out3 = jax.block_until_ready(haarpsi_score(x3, y3, c_param))
    assert jnp.allclose(out3, haarpsi_score_ref(x3, y3, c_param),
                        atol=1e-5, rtol=1e-5)

    # 5) Multi-step grid (even split for megacore) with a partial trailing block:
    #    rows = 40 -> 2 blocks of 32 rows.
    x5 = jax.random.normal(kx, (5, 8, 128), dtype=jnp.float32)
    y5 = jax.random.normal(ky, (5, 8, 128), dtype=jnp.float32)
    out5 = jax.block_until_ready(haarpsi_score(x5, y5, c_param))
    assert jnp.allclose(out5, haarpsi_score_ref(x5, y5, c_param),
                        atol=1e-5, rtol=1e-5)

    print("KERNEL_OK")
</pallas_src>

<mosaic_0001>
module attributes {stable_mosaic.version = 11 : i64} {
  func.func @_haarpsi_score_kernel(%arg0: i32, %arg1: memref<1xf32, #tpu.memory_space<smem>>, %arg2: memref<16x128xf32, #tpu.memory_space<vmem>>, %arg3: memref<16x128xf32, #tpu.memory_space<vmem>>, %arg4: memref<16x128xf32, #tpu.memory_space<vmem>>) attributes {dimension_semantics = [#tpu.dimension_semantics<parallel>], iteration_bounds = array<i64: 1>, scalar_prefetch = 0 : i64, scratch_operands = 0 : i64, tpu.core_type = #tpu.core_type<tc>, window_params = [{transform_indices = @transform_0, window_bounds = array<i64: 1>}, {transform_indices = @transform_1, window_bounds = array<i64: 16, 128>}, {transform_indices = @transform_2, window_bounds = array<i64: 16, 128>}, {transform_indices = @transform_3, window_bounds = array<i64: 16, 128>}]} {
    %c0 = arith.constant 0 : index
    %0 = memref.load %arg1[%c0] : memref<1xf32, #tpu.memory_space<smem>>
    %1 = arith.mulf %0, %0 : f32
    %c0_0 = arith.constant 0 : index
    %c0_1 = arith.constant 0 : index
    %2 = vector.load %arg2[%c0_0, %c0_1] : memref<16x128xf32, #tpu.memory_space<vmem>>, vector<16x128xf32>
    %c0_2 = arith.constant 0 : index
    %c0_3 = arith.constant 0 : index
    %3 = vector.load %arg3[%c0_2, %c0_3] : memref<16x128xf32, #tpu.memory_space<vmem>>, vector<16x128xf32>
    %cst = arith.constant 2.000000e+00 : f32
    %4 = vector.broadcast %cst : f32 to vector<16x128xf32>
    %5 = arith.mulf %4, %2 : vector<16x128xf32>
    %6 = arith.mulf %5, %3 : vector<16x128xf32>
    %7 = vector.broadcast %1 : f32 to vector<16x128xf32>
    %8 = arith.addf %6, %7 : vector<16x128xf32>
    %9 = arith.mulf %2, %2 : vector<16x128xf32>
    %10 = arith.mulf %3, %3 : vector<16x128xf32>
    %11 = arith.addf %9, %10 : vector<16x128xf32>
    %12 = vector.broadcast %1 : f32 to vector<16x128xf32>
    %13 = arith.addf %11, %12 : vector<16x128xf32>
    %14 = arith.divf %8, %13 : vector<16x128xf32>
    %c0_4 = arith.constant 0 : index
    %c0_5 = arith.constant 0 : index
    %15 = vector.load %arg4[%c0_4, %c0_5] : memref<16x128xf32, #tpu.memory_space<vmem>>, vector<16x128xf32>
    tpu.vector_store %arg4[%c0_4, %c0_5], %14 {strides = array<i32>} : memref<16x128xf32, #tpu.memory_space<vmem>>, vector<16x128xf32>,
    return
  }
  func.func @transform_0(%arg0: i32) -> i32 {
    %c0_i32 = arith.constant 0 : i32
    %c0_i32_0 = arith.constant 0 : i32
    return %c0_i32 : i32
  }
  func.func @transform_1(%arg0: i32) -> (i32, i32) {
    %c0_i32 = arith.constant 0 : i32
    %c0_i32_0 = arith.constant 0 : i32
    return %arg0, %c0_i32 : i32, i32
  }
  func.func @transform_2(%arg0: i32) -> (i32, i32) {
    %c0_i32 = arith.constant 0 : i32
    %c0_i32_0 = arith.constant 0 : i32
    return %arg0, %c0_i32 : i32, i32
  }
  func.func @transform_3(%arg0: i32) -> (i32, i32) {
    %c0_i32 = arith.constant 0 : i32
    %c0_i32_0 = arith.constant 0 : i32
    return %arg0, %c0_i32 : i32, i32
  }
}

</mosaic_0001>

<bundles_post_ra>
// kernel: tpu_custom_call.1
= control target key start
LH: loop header
LB: loop body
LE: loop exit
PB: predicated region body
PF: predicated region fallthrough
CT: control target
= control target key end

     0   :  { %9 = vsyncpa [#allocation4], 0  ;;  %s261_s0 = inlined_call_operand.<no memory space> [shape: f32[1], index: 0, kind: input, shape index: {}]   ;;  %s262_s1 = inlined_call_operand.hbm [shape: f32[16,128], index: 1, kind: input, shape index: {}]   ;;  %s263_s2 = inlined_call_operand.hbm [shape: f32[16,128], index: 2, kind: input, shape index: {}]   ;;  %s264_s3 = inlined_call_operand.hbm [shape: f32[16,128], index: 3, kind: output, shape index: {}]  }
   0x1   :  { %10 = vsyncpa [#allocation7], 0 }
   0x2   :  { %11 = vsyncpa [#allocation5], 0  ;;  %s18_s14 = sshll.u32 %s262_s1, 4  ;;  %s208_s15 = smov [#allocation3]   ;;  %s19_s14 = int_to_ptr.hbm [resolvable:$true] %s18_s14 }
   0x3   :  { %s20_s16 = sshll.u32 %s208_s15, 4  ;;  %s31_s19 = sshll.u32 %s263_s2, 4  ;;  %s21_s16 = int_to_ptr.vmem [resolvable:$true] %s20_s16  ;;  %s32_s19 = int_to_ptr.hbm [resolvable:$true] %s31_s19 }
   0x4   :  { %s209_s20 = smov 128   ;;  %s210_s21 = smov 8  }
   0x5   :  { %26 = dma.hbm_to_vmem [thread:$0]  %s19_s14, 256, %s21_s16, [#allocation4], %s209_s20, %s209_s20, %s210_s21  }
   0x6   :  { %s211_s22 = smov [#allocation6]  }
   0x7   :  { %s33_s23 = sshll.u32 %s211_s22, 4  ;;  %s34_s23 = int_to_ptr.vmem [resolvable:$true] %s33_s23 }
   0x8   :  { %39 = dma.hbm_to_vmem [thread:$0]  %s32_s19, 256, %s34_s23, [#allocation7], %s209_s20, %s209_s20, %s210_s21  }
   0x9   :  { %202 = dma.done.wait [#allocation4], 256  }
   0xa   :  { %203 = vsyncadd [#allocation4], 4294967040 }
   0xb   :  { %204 = dma.done.wait [#allocation7], 256  }
   0xc   :  { %205 = vsyncadd [#allocation7], 4294967040  ;;  %s49_s24 = smul.f32 %s261_s0, %s261_s0  ;;  %v50_v0 = vld [vmem:[#allocation3] sm:$0xff]  ;;  %v52_v1 = vld [vmem:[#allocation6] sm:$0xff]  ;;  %s212_s0 = smov [#allocation8]  }
   0xd   :  { %v51_v2 = vld [vmem:[#allocation3 + $0x8] sm:$0xff]  ;;  %v61_v3 = vmul.f32 %v50_v0, %v50_v0  ;;  %v63_v4 = vmul.f32 %v52_v1, %v52_v1  ;;  %v53_v5 = vld [vmem:[#allocation6 + $0x8] sm:$0xff]  ;;  %v54_v13 = vmul.f32 2.0, %v50_v0  ;;  %s105_s25 = sshll.u32 %s212_s0, 4  ;;  %s107_s28 = sshll.u32 %s264_s3, 4  ;;  %s106_s25 = int_to_ptr.vmem [resolvable:$true] %s105_s25  ;;  %s108_s28 = int_to_ptr.hbm [resolvable:$true] %s107_s28 }
   0xe   :  { %v58_v6 = vstv %s49_s24  ;;  %v62_v7 = vmul.f32 %v51_v2, %v51_v2  ;;  %v64_v8 = vmul.f32 %v53_v5, %v53_v5  ;;  %v55_v14 = vmul.f32 2.0, %v51_v2 }
   0xf   :  { %v65_v9 = vadd.f32 %v63_v4, %v61_v3  ;;  %v56_v17 = vmul.f32 %v54_v13, %v52_v1 }
  0x10   :  { %v66_v10 = vadd.f32 %v64_v8, %v62_v7  ;;  %v57_v20 = vmul.f32 %v55_v14, %v53_v5 }
  0x11   :  { %v67_v11 = vadd.f32 %v65_v9, %v58_v6  ;;  %v59_v31 = vadd.f32 %v58_v6, %v56_v17 }
  0x12   :  { %v68_v12 = vadd.f32 %v66_v10, %v58_v6  ;;  %v60_v34 = vadd.f32 %v58_v6, %v57_v20 }
  0x13   :  { %126 = vrcp.f32 %v67_v11  ;;  %vm74_vm0 = vweird.f32 %v67_v11  ;;  %v80_v19 = vand.u32 2147483648, %v67_v11  ;;  %v78_v23 = vand.u32 2147483647, %v67_v11 }
  0x14   :  { %128 = vrcp.f32 %v68_v12  ;;  %v95_v24 = vand.u32 2147483648, %v68_v12  ;;  %vm89_vm2 = vweird.f32 %v68_v12  ;;  %v93_v26 = vand.u32 2147483647, %v68_v12 }
  0x15   :  { %v81_v29 = vor.u32 1.1754944e-38, %v80_v19  ;;  %vm79_vm5 = vcmp.eq.f32.partialorder %v78_v23, 8.507059e+37 }
  0x16   :  { %v96_v33 = vor.u32 1.1754944e-38, %v95_v24  ;;  %vm94_vm7 = vcmp.eq.f32.partialorder %v93_v26, 8.507059e+37 }
  0x19   :  { %v127_v15 = vpop.eup %126 }
  0x1a   :  { %v129_v16 = vpop.eup %128  ;;  %v70_v18 = vmul.f32 %v127_v15, %v67_v11  ;;  %vm75_vm1 = vweird.f32 %v127_v15 }
  0x1b   :  { %v85_v21 = vmul.f32 %v129_v16, %v68_v12  ;;  %vm90_vm3 = vweird.f32 %v129_v16  ;;  %vm249_vm4 = vmor %vm74_vm0, %vm75_vm1 }
  0x1c   :  { %v71_v22 = vsub.f32 1.0, %v70_v18  ;;  %vm91_vm6 = vmor %vm89_vm2, %vm90_vm3 }
  0x1d   :  { %v86_v25 = vsub.f32 1.0, %v85_v21 }
  0x1e   :  { %v72_v27 = vmul.f32 %v127_v15, %v71_v22 }
  0x1f   :  { %v87_v30 = vmul.f32 %v129_v16, %v86_v25 }
  0x20   :  { %v73_v32 = vadd.f32 %v127_v15, %v72_v27 }
  0x21   :  { %v88_v35 = vadd.f32 %v129_v16, %v87_v30 }
  0x22   :  { %v77_v36 = vsel %vm249_vm4, %v127_v15, %v73_v32 }
  0x23   :  { %v82_v37 = vsel %vm79_vm5, %v81_v29, %v77_v36  ;;  %v92_v38 = vsel %vm91_vm6, %v129_v16, %v88_v35 }
  0x24   :  { %v83_v39 = vmul.f32 %v82_v37, %v59_v31  ;;  %v97_v40 = vsel %vm94_vm7, %v96_v33, %v92_v38 }
  0x25   :  { %v98_v41 = vmul.f32 %v97_v40, %v60_v34 }
  0x26   :  { %99 = vst [vmem:[#allocation8] sm:$0xff] %v83_v39 }
  0x27   :  { %100 = vst [vmem:[#allocation8 + $0x8] sm:$0xff] %v98_v41 }
  0x28   :  { %113 = dma.vmem_to_hbm [thread:$0]  %s106_s25, 256, %s108_s28, [#allocation5], %s209_s20, %s209_s20, %s210_s21  }
  0x29   :  { %206 = dma.done.wait [#allocation5], 256  }
  0x2a   :  { %207 = vsyncadd [#allocation5], 4294967040 }
  0x2b   :  { %118 = vsyncpa [#allocation4], 1 }
  0x2c   :  { %119 = vsyncpa [#allocation7], 1 }
  0x2d   :  { %120 = vsyncpa [#allocation5], 1 }

</bundles_post_ra>
